<compile_context>
chip_gen: v5e
topology: v5e:2x2
jax: 0.10.0
libtpu: 0.0.40
codegen_flags: <defaults>
</compile_context>

<pallas_src>
import functools

import jax
import jax.numpy as jnp
from jax.experimental import pallas as pl
from jax.experimental.pallas import tpu as pltpu


# --------------------------------------------------------------------------
# Pallas kernels
# --------------------------------------------------------------------------
def _conv_stats_kernel(p_ref, w_ref, s_ref, ss_ref):
    """Conv-as-matmul for one M tile, emitting only per-tile BN partials."""
    # (C8, K) @ (K, tm) -> (C8, tm), f32 accumulation on the MXU.
    y = jnp.dot(w_ref[...], p_ref[...], preferred_element_type=jnp.float32)
    # Lane (M) reductions land on the XLU slot; direct stores, no concat.
    s_ref[0] = jnp.sum(y, axis=1, keepdims=True)        # (C8, 1)
    ss_ref[0] = jnp.sum(y * y, axis=1, keepdims=True)   # (C8, 1)


def _conv_bn_act_kernel(p_ref, w_ref, scale_ref, shift_ref, o_ref, *,
                        negative_slope):
    """Recompute conv tile, normalize + affine + LeakyReLU, store (C8, tm)."""
    y = jnp.dot(w_ref[...], p_ref[...], preferred_element_type=jnp.float32)
    y = y * scale_ref[...] + shift_ref[...]              # (C8,1) bcast on lanes
    if negative_slope != 1.0:                            # static Python branch
        y = jnp.where(y >= 0.0, y, negative_slope * y)
    o_ref[...] = y.astype(o_ref.dtype)


# --------------------------------------------------------------------------
# Wrapper: DownBlock forward (NCHW in / NCHW out, PyTorch semantics)
# --------------------------------------------------------------------------
def _round_up(a, b):
    return (a + b - 1) // b * b


@functools.partial(
    jax.jit,
    static_argnames=("eps", "stride", "padding", "tm", "negative_slope",
                     "compute_dtype"))
def down_block_forward(x, weight, gamma, beta, *, eps=1e-5, stride=2,
                       padding=1, tm=1024, negative_slope=1.0,
                       compute_dtype=jnp.bfloat16):
    n, cin, h, w = x.shape
    cout, cin_w, kh, kw = weight.shape
    assert cin == cin_w
    ho = (h + 2 * padding - kh) // stride + 1
    wo = (w + 2 * padding - kw) // stride + 1

    m = n * ho * wo                 # output pixels = BN sample count
    k = cin * kh * kw               # contraction size
    c8 = _round_up(cout, 8)         # sublane-aligned channel dim (no 128 pad)

    # ---- M tiling: M sits on lanes, so tiles are multiples of 128.  Keep at
    # least 2 tiles when possible so the "parallel" axis shards across v7x's
    # two TensorCores.  Ragged tail is zero-padded; zero patch columns give
    # zero conv columns which add nothing to the BN sums (divide by true m).
    m_ceil = _round_up(m, 128)
    tm_eff = _round_up(min(tm, m_ceil), 128)
    if m_ceil // tm_eff < 2 and m_ceil >= 256:
        tm_eff = _round_up(m_ceil // 2, 128)
    m_pad = _round_up(m, tm_eff)
    n_tiles = m_pad // tm_eff

    # ---- im2col glue (plain JAX: pad / strided slice / stack / reshape),
    # built K-major so the kernels need no transposes.  Cast to bf16 first so
    # the glue traffic is already half-width.
    # TODO(synk): move patch construction in-kernel (manual DMA from the
    # NCHW input) to avoid the 4x HBM read amplification of im2col.
    xc = x.astype(compute_dtype)
    wc = weight.astype(compute_dtype)
    xp = jnp.pad(xc, ((0, 0), (0, 0), (padding, padding), (padding, padding)))
    cols = []
    for dh in range(kh):
        for dw in range(kw):
            cols.append(
                xp[:, :, dh:dh + stride * ho:stride, dw:dw + stride * wo:stride])
    patches = jnp.stack(cols, axis=2)                     # (N, Cin, KH*KW, Ho, Wo)
    p_t = patches.transpose(1, 2, 0, 3, 4).reshape(k, m)  # (K, M), K matches OIHW flatten
    p_t = jnp.pad(p_t, ((0, 0), (0, m_pad - m)))          # zero cols -> zero conv cols

    w_mat = jnp.pad(wc.reshape(cout, k), ((0, c8 - cout), (0, 0)))  # (C8, K)

    # Patch-tile spec shared by both passes; deepen buffering when the grid is
    # deep enough to benefit (DMA-latency-bound pass, tiny compute per tile).
    p_kwargs = {}
    if n_tiles >= 3:
        p_kwargs["pipeline_mode"] = pl.Buffered(3)
    p_spec = pl.BlockSpec((k, tm_eff), lambda i: (0, i), **p_kwargs)
    w_spec = pl.BlockSpec((c8, k), lambda i: (0, 0))      # resident across tiles

    cparams = pltpu.CompilerParams(
        dimension_semantics=("parallel",),
        vmem_limit_bytes=32 * 1024 * 1024)  # load-bearing on v5e, safe on v7x

    # ---- pass 1: per-tile BN partial statistics only (no Y written to HBM)
    sums, sqs = pl.pallas_call(
        _conv_stats_kernel,
        out_shape=(jax.ShapeDtypeStruct((n_tiles, c8, 1), jnp.float32),
                   jax.ShapeDtypeStruct((n_tiles, c8, 1), jnp.float32)),
        grid_spec=pltpu.PrefetchScalarGridSpec(
            num_scalar_prefetch=0,
            grid=(n_tiles,),
            in_specs=[p_spec, w_spec],
            out_specs=[pl.BlockSpec((1, c8, 1), lambda i: (i, 0, 0)),
                       pl.BlockSpec((1, c8, 1), lambda i: (i, 0, 0))]),
        compiler_params=cparams,
    )(p_t, w_mat)

    # ---- tiny JAX reduction of per-tile partials -> BN scale / shift
    s_tot = jnp.sum(sums[:, :, 0], axis=0)                # (C8,)
    ss_tot = jnp.sum(sqs[:, :, 0], axis=0)                # (C8,)
    mean = s_tot / m
    var = jnp.maximum(ss_tot / m - mean * mean, 0.0)      # biased var (training)
    gamma_p = jnp.pad(gamma.astype(jnp.float32), (0, c8 - cout))
    beta_p = jnp.pad(beta.astype(jnp.float32), (0, c8 - cout))
    scale = gamma_p * jax.lax.rsqrt(var + eps)
    shift = beta_p - mean * scale

    # ---- pass 2: recompute conv tile + BN + activation, lane-dense (C8, M)
    out_t = pl.pallas_call(
        functools.partial(_conv_bn_act_kernel, negative_slope=negative_slope),
        out_shape=jax.ShapeDtypeStruct((c8, m_pad), jnp.float32),
        grid_spec=pltpu.PrefetchScalarGridSpec(
            num_scalar_prefetch=0,
            grid=(n_tiles,),
            in_specs=[p_spec, w_spec,
                      pl.BlockSpec((c8, 1), lambda i: (0, 0)),
                      pl.BlockSpec((c8, 1), lambda i: (0, 0))],
            out_specs=pl.BlockSpec((c8, tm_eff), lambda i: (0, i))),
        compiler_params=cparams,
    )(p_t, w_mat, scale.reshape(c8, 1), shift.reshape(c8, 1))

    # Small epilogue: (C8, M_pad) -> valid channels/pixels -> NCHW.
    out = out_t[:cout, :m].reshape(cout, n, ho, wo).transpose(1, 0, 2, 3)
    return out.astype(x.dtype)


# --------------------------------------------------------------------------
# Pure-JAX reference (for correctness check)
# --------------------------------------------------------------------------
def down_block_ref(x, weight, gamma, beta, eps=1e-5):
    conv = jax.lax.conv_general_dilated(
        x, weight, window_strides=(2, 2), padding=((1, 1), (1, 1)),
        dimension_numbers=("NCHW", "OIHW", "NCHW"))
    mu = conv.mean(axis=(0, 2, 3), keepdims=True)
    var = conv.var(axis=(0, 2, 3), keepdims=True)
    y = (conv - mu) / jnp.sqrt(var + eps)
    y = y * gamma.reshape(1, -1, 1, 1) + beta.reshape(1, -1, 1, 1)
    return jnp.where(y >= 0.0, y, 1.0 * y)      # LeakyReLU(negative_slope=1.0)


if __name__ == "__main__":
    # DownBlock(in_channels=4, out_channels=8, kernel_size=4)
    N, CIN, COUT, H, W, KS = 2, 4, 8, 16, 16, 4

    key = jax.random.PRNGKey(0)
    kx, kwt = jax.random.split(key, 2)
    x = jax.random.normal(kx, (N, CIN, H, W), dtype=jnp.float32)

    fan_in = CIN * KS * KS
    weight = jax.random.normal(kwt, (COUT, CIN, KS, KS), dtype=jnp.float32) \
             * (1.0 / jnp.sqrt(fan_in))
    gamma = jnp.ones((COUT,), dtype=jnp.float32)   # BatchNorm weight
    beta = jnp.zeros((COUT,), dtype=jnp.float32)   # BatchNorm bias

    out = jax.block_until_ready(down_block_forward(x, weight, gamma, beta))
    ref = down_block_ref(x, weight, gamma, beta)

    assert out.shape == (N, COUT, H // 2, W // 2), out.shape
    max_err = float(jnp.max(jnp.abs(out - ref)))
    # bf16 MXU operands (f32 accumulation) vs. pure-f32 reference: loosened
    # tolerance. Pass compute_dtype=jnp.float32 to match PyTorch bit-closer.
    assert max_err < 5e-2, max_err

    print("KERNEL_OK")
</pallas_src>

<mosaic_0001>
module attributes {stable_mosaic.version = 11 : i64} {
  func.func @_conv_stats_kernel(%arg0: i32, %arg1: memref<64x128xbf16, #tpu.memory_space<vmem>>, %arg2: memref<8x64xbf16, #tpu.memory_space<vmem>>, %arg3: memref<1x8x1xf32, #tpu.memory_space<vmem>>, %arg4: memref<1x8x1xf32, #tpu.memory_space<vmem>>) attributes {dimension_semantics = [#tpu.dimension_semantics<parallel>], iteration_bounds = array<i64: 1>, scalar_prefetch = 0 : i64, scratch_operands = 0 : i64, tpu.core_type = #tpu.core_type<tc>, window_params = [{transform_indices = @transform_0, window_bounds = array<i64: 64, 128>}, {pipeline_mode = #tpu.pipeline_mode<synchronous>, transform_indices = @transform_1, window_bounds = array<i64: 8, 64>}, {transform_indices = @transform_2, window_bounds = array<i64: 1, 8, 1>}, {transform_indices = @transform_3, window_bounds = array<i64: 1, 8, 1>}]} {
    %c0 = arith.constant 0 : index
    %c0_0 = arith.constant 0 : index
    %0 = vector.load %arg2[%c0, %c0_0] : memref<8x64xbf16, #tpu.memory_space<vmem>>, vector<8x64xbf16>
    %c0_1 = arith.constant 0 : index
    %c0_2 = arith.constant 0 : index
    %1 = vector.load %arg1[%c0_1, %c0_2] : memref<64x128xbf16, #tpu.memory_space<vmem>>, vector<64x128xbf16>
    %cst = arith.constant dense<0.000000e+00> : vector<8x128xf32>
    %2 = tpu.matmul %0, %1, %cst {dimension_numbers = #tpu.dot_dimension_numbers<[1], [0], [0], [1], [0, 0, 1, 1], [], []>} : vector<8x64xbf16>, vector<64x128xbf16>, vector<8x128xf32> -> vector<8x128xf32>
    %cst_3 = arith.constant dense<0.000000e+00> : vector<8xf32>
    %3 = vector.multi_reduction <add>, %2, %cst_3 [1] : vector<8x128xf32> to vector<8xf32>
    %4 = vector.shape_cast %3 : vector<8xf32> to vector<8x1xf32>
    %c0_4 = arith.constant 0 : index
    %c0_5 = arith.constant 0 : index
    %c0_6 = arith.constant 0 : index
    %5 = vector.load %arg3[%c0_4, %c0_5, %c0_6] : memref<1x8x1xf32, #tpu.memory_space<vmem>>, vector<1x8x1xf32>
    %6 = vector.shape_cast %5 : vector<1x8x1xf32> to vector<8x1xf32>
    %7 = vector.shape_cast %4 : vector<8x1xf32> to vector<1x8x1xf32>
    tpu.vector_store %arg3[%c0_4, %c0_5, %c0_6], %7 {strides = array<i32>} : memref<1x8x1xf32, #tpu.memory_space<vmem>>, vector<1x8x1xf32>,
    %8 = arith.mulf %2, %2 : vector<8x128xf32>
    %cst_7 = arith.constant dense<0.000000e+00> : vector<8xf32>
    %9 = vector.multi_reduction <add>, %8, %cst_7 [1] : vector<8x128xf32> to vector<8xf32>
    %10 = vector.shape_cast %9 : vector<8xf32> to vector<8x1xf32>
    %c0_8 = arith.constant 0 : index
    %c0_9 = arith.constant 0 : index
    %c0_10 = arith.constant 0 : index
    %11 = vector.load %arg4[%c0_8, %c0_9, %c0_10] : memref<1x8x1xf32, #tpu.memory_space<vmem>>, vector<1x8x1xf32>
    %12 = vector.shape_cast %11 : vector<1x8x1xf32> to vector<8x1xf32>
    %13 = vector.shape_cast %10 : vector<8x1xf32> to vector<1x8x1xf32>
    tpu.vector_store %arg4[%c0_8, %c0_9, %c0_10], %13 {strides = array<i32>} : memref<1x8x1xf32, #tpu.memory_space<vmem>>, vector<1x8x1xf32>,
    return
  }
  func.func @transform_0(%arg0: i32) -> (i32, i32) {
    %c0_i32 = arith.constant 0 : i32
    %c0_i32_0 = arith.constant 0 : i32
    return %c0_i32, %arg0 : i32, i32
  }
  func.func @transform_1(%arg0: i32) -> (i32, i32) {
    %c0_i32 = arith.constant 0 : i32
    %c0_i32_0 = arith.constant 0 : i32
    %c0_i32_1 = arith.constant 0 : i32
    return %c0_i32, %c0_i32_0 : i32, i32
  }
  func.func @transform_2(%arg0: i32) -> (i32, i32, i32) {
    %c0_i32 = arith.constant 0 : i32
    %c0_i32_0 = arith.constant 0 : i32
    %c0_i32_1 = arith.constant 0 : i32
    return %arg0, %c0_i32, %c0_i32_0 : i32, i32, i32
  }
  func.func @transform_3(%arg0: i32) -> (i32, i32, i32) {
    %c0_i32 = arith.constant 0 : i32
    %c0_i32_0 = arith.constant 0 : i32
    %c0_i32_1 = arith.constant 0 : i32
    return %arg0, %c0_i32, %c0_i32_0 : i32, i32, i32
  }
}

module attributes {stable_mosaic.version = 11 : i64} {
  func.func @_conv_bn_act_kernel(%arg0: i32, %arg1: memref<64x128xbf16, #tpu.memory_space<vmem>>, %arg2: memref<8x64xbf16, #tpu.memory_space<vmem>>, %arg3: memref<8x1xf32, #tpu.memory_space<vmem>>, %arg4: memref<8x1xf32, #tpu.memory_space<vmem>>, %arg5: memref<8x128xf32, #tpu.memory_space<vmem>>) attributes {dimension_semantics = [#tpu.dimension_semantics<parallel>], iteration_bounds = array<i64: 1>, scalar_prefetch = 0 : i64, scratch_operands = 0 : i64, tpu.core_type = #tpu.core_type<tc>, window_params = [{transform_indices = @transform_0, window_bounds = array<i64: 64, 128>}, {pipeline_mode = #tpu.pipeline_mode<synchronous>, transform_indices = @transform_1, window_bounds = array<i64: 8, 64>}, {pipeline_mode = #tpu.pipeline_mode<synchronous>, transform_indices = @transform_2, window_bounds = array<i64: 8, 1>}, {pipeline_mode = #tpu.pipeline_mode<synchronous>, transform_indices = @transform_3, window_bounds = array<i64: 8, 1>}, {transform_indices = @transform_4, window_bounds = array<i64: 8, 128>}]} {
    %c0 = arith.constant 0 : index
    %c0_0 = arith.constant 0 : index
    %0 = vector.load %arg2[%c0, %c0_0] : memref<8x64xbf16, #tpu.memory_space<vmem>>, vector<8x64xbf16>
    %c0_1 = arith.constant 0 : index
    %c0_2 = arith.constant 0 : index
    %1 = vector.load %arg1[%c0_1, %c0_2] : memref<64x128xbf16, #tpu.memory_space<vmem>>, vector<64x128xbf16>
    %cst = arith.constant dense<0.000000e+00> : vector<8x128xf32>
    %2 = tpu.matmul %0, %1, %cst {dimension_numbers = #tpu.dot_dimension_numbers<[1], [0], [0], [1], [0, 0, 1, 1], [], []>} : vector<8x64xbf16>, vector<64x128xbf16>, vector<8x128xf32> -> vector<8x128xf32>
    %c0_3 = arith.constant 0 : index
    %c0_4 = arith.constant 0 : index
    %3 = vector.load %arg3[%c0_3, %c0_4] : memref<8x1xf32, #tpu.memory_space<vmem>>, vector<8x1xf32>
    %4 = vector.broadcast %3 : vector<8x1xf32> to vector<8x128xf32>
    %5 = arith.mulf %2, %4 : vector<8x128xf32>
    %c0_5 = arith.constant 0 : index
    %c0_6 = arith.constant 0 : index
    %6 = vector.load %arg4[%c0_5, %c0_6] : memref<8x1xf32, #tpu.memory_space<vmem>>, vector<8x1xf32>
    %7 = vector.broadcast %6 : vector<8x1xf32> to vector<8x128xf32>
    %8 = arith.addf %5, %7 : vector<8x128xf32>
    %c0_7 = arith.constant 0 : index
    %c0_8 = arith.constant 0 : index
    %9 = vector.load %arg5[%c0_7, %c0_8] : memref<8x128xf32, #tpu.memory_space<vmem>>, vector<8x128xf32>
    tpu.vector_store %arg5[%c0_7, %c0_8], %8 {strides = array<i32>} : memref<8x128xf32, #tpu.memory_space<vmem>>, vector<8x128xf32>,
    return
  }
  func.func @transform_0(%arg0: i32) -> (i32, i32) {
    %c0_i32 = arith.constant 0 : i32
    %c0_i32_0 = arith.constant 0 : i32
    return %c0_i32, %arg0 : i32, i32
  }
  func.func @transform_1(%arg0: i32) -> (i32, i32) {
    %c0_i32 = arith.constant 0 : i32
    %c0_i32_0 = arith.constant 0 : i32
    %c0_i32_1 = arith.constant 0 : i32
    return %c0_i32, %c0_i32_0 : i32, i32
  }
  func.func @transform_2(%arg0: i32) -> (i32, i32) {
    %c0_i32 = arith.constant 0 : i32
    %c0_i32_0 = arith.constant 0 : i32
    %c0_i32_1 = arith.constant 0 : i32
    return %c0_i32, %c0_i32_0 : i32, i32
  }
  func.func @transform_3(%arg0: i32) -> (i32, i32) {
    %c0_i32 = arith.constant 0 : i32
    %c0_i32_0 = arith.constant 0 : i32
    %c0_i32_1 = arith.constant 0 : i32
    return %c0_i32, %c0_i32_0 : i32, i32
  }
  func.func @transform_4(%arg0: i32) -> (i32, i32) {
    %c0_i32 = arith.constant 0 : i32
    %c0_i32_0 = arith.constant 0 : i32
    return %c0_i32, %arg0 : i32, i32
  }
}

</mosaic_0001>

<bundles_post_ra>
// kernel: down_block_forward.2
= control target key start
LH: loop header
LB: loop body
LE: loop exit
PB: predicated region body
PF: predicated region fallthrough
CT: control target
= control target key end

     0   :  { %vm47_vm0 = vcmask 523264   ;;  %vm66_vm1 = vcmask 7168   ;;  %s142_s0 = inlined_call_operand.vmem [shape: bf16[64,128], index: 0, kind: input, shape index: {}]   ;;  %s143_s1 = inlined_call_operand.vmem [shape: bf16[8,64], index: 1, kind: input, shape index: {}]   ;;  %s144_s2 = inlined_call_operand.vmem [shape: f32[1,8,1], index: 2, kind: output, shape index: {0}]   ;;  %s145_s3 = inlined_call_operand.vmem [shape: f32[1,8,1], index: 3, kind: output, shape index: {1}]  }
   0x1   :  { %v100_v0 = vld [vmem:[%s142_s0 + $0x18] sm:$0xff]  ;;  %v99_v1 = vld [vmem:[%s142_s0 + $0x10] sm:$0xff]  ;;  %v98_v2 = vld [vmem:[%s142_s0 + $0x8] sm:$0xff] }
   0x2   :  { %55 = vmatpush.bf16.msra.mxu0 %v100_v0  ;;  %v97_v3 = vld [vmem:[%s142_s0] sm:$0xff] }
   0x3   :  { %v14_v4 = vld [vmem:[%s143_s1] sm:$0xf] }
   0x6   :  { %56 = vmatpush.bf16.msra.mxu0 %v99_v1 }
   0xa   :  { %57 = vmatpush.bf16.msra.mxu0 %v98_v2 }
   0xe   :  { %58 = vmatpush.bf16.msra.mxu0 %v97_v3 }
  0x11   :  { %96 = vmatmul.msk.bf16.vlgmr.msra.gmra.mxu0 %vm47_vm0, %v14_v4 }
  0x8e   :  { %v60_v5 = vpop.f32.mrf.mxu0 }
  0x8f   :  { %64 = vadd.xlane.f32.xlu0 %v60_v5  ;;  %v68_v6 = vmul.f32 %v60_v5, %v60_v5 }
  0x96   :  { %v62_v7 = vpop.f32.mrf.mxu0 }
  0x97   :  { %69 = vadd.xlane.f32.xlu0 %v68_v6 }
 0x102   :  { %v65_v8 = vpop.xlane.xlu0 %64 }
 0x103   :  { %67 = vst.msk [vmem:[%s144_s2] sm:$0xff] %vm66_vm1, %v65_v8 }
 0x10a   :  { %v70_v9 = vpop.xlane.xlu0 %69 }
 0x10b   :  { %71 = vst.msk [vmem:[%s145_s3] sm:$0xff] %vm66_vm1, %v70_v9 }

// kernel: down_block_forward.3
= control target key start
LH: loop header
LB: loop body
LE: loop exit
PB: predicated region body
PF: predicated region fallthrough
CT: control target
= control target key end

     0   :  { %v110_v1 = vmov 0   ;;  %vm51_vm0 = vcmask 523264   ;;  %s160_s0 = inlined_call_operand.vmem [shape: bf16[64,128], index: 0, kind: input, shape index: {}]   ;;  %s161_s2 = inlined_call_operand.vmem [shape: f32[8,1], index: 2, kind: input, shape index: {}]   ;;  %s162_s3 = inlined_call_operand.vmem [shape: f32[8,1], index: 3, kind: input, shape index: {}]   ;;  %s163_s1 = inlined_call_operand.vmem [shape: bf16[8,64], index: 1, kind: input, shape index: {}]   ;;  %s164_s4 = inlined_call_operand.vmem [shape: f32[8,128], index: 4, kind: output, shape index: {}]  }
   0x1   :  { %v107_v0 = vld [vmem:[%s160_s0 + $0x18] sm:$0xff]  ;;  %109 = vset.pattern.permute.xlu0 %v110_v1  ;;  %v68_v2 = vld [vmem:[%s161_s2] sm:$0xff]  ;;  %v106_v3 = vld [vmem:[%s160_s0 + $0x10] sm:$0xff] }
   0x2   :  { %59 = vmatpush.bf16.msra.mxu0 %v107_v0  ;;  %71 = vperm.xlu0 %109, %v68_v2   ;;  %v105_v4 = vld [vmem:[%s160_s0 + $0x8] sm:$0xff]  ;;  %v75_v5 = vld [vmem:[%s162_s3] sm:$0xff] }
   0x3   :  { %v104_v6 = vld [vmem:[%s160_s0] sm:$0xff] }
   0x4   :  { %v18_v7 = vld [vmem:[%s163_s1] sm:$0xf] }
   0x6   :  { %60 = vmatpush.bf16.msra.mxu0 %v106_v3 }
   0xa   :  { %61 = vmatpush.bf16.msra.mxu0 %v105_v4  ;;  %78 = vperm.xlu0 %109, %v75_v5  }
   0xe   :  { %62 = vmatpush.bf16.msra.mxu0 %v104_v6 }
  0x11   :  { %103 = vmatmul.msk.bf16.vlgmr.msra.gmra.mxu0 %vm51_vm0, %v18_v7 }
  0x74   :  { %v72_v8 = vpop.permute.xlu0 %71 }
  0x7c   :  { %v79_v11 = vpop.permute.xlu0 %78 }
  0x8e   :  { %v64_v9 = vpop.f32.mrf.mxu0 }
  0x8f   :  { %v74_v10 = vmul.f32 %v72_v8, %v64_v9 }
  0x91   :  { %v81_v12 = vadd.f32 %v79_v11, %v74_v10 }
  0x93   :  { %82 = vst [vmem:[%s164_s4] sm:$0xff] %v81_v12 }
  0x96   :  { %v66_v13 = vpop.f32.mrf.mxu0 }

</bundles_post_ra>
